<compile_context>
chip_gen: v5e
topology: v5e:2x2
jax: 0.10.0
libtpu: 0.0.40
codegen_flags: <defaults>
</compile_context>

<pallas_src>
import functools

import jax
import jax.numpy as jnp
from jax.experimental import pallas as pl
from jax.experimental.pallas import tpu as pltpu


# ----------------------------- Pallas kernel -----------------------------

def _l1_loss_kernel(feat_ref, ind_ref, mask_ref, tgt_ref, o_ref, acc_ref, *, inv_total):
    """Per-batch step: gather via one-hot matmul, mask, |diff|, reduce, accumulate."""
    b = pl.program_id(0)

    @pl.when(b == 0)
    def _init():
        acc_ref[...] = jnp.zeros_like(acc_ref)

    feat = feat_ref[0]       # (C, HW)  float32  -- NCHW feature map, flattened spatial
    idx = ind_ref[0]         # (1, K)   int32
    msk = mask_ref[0]        # (1, K)   float32
    tgt = tgt_ref[0]         # (C, K)   float32  -- target transposed to channel-major

    hw = feat.shape[1]
    k = idx.shape[1]

    # one_hot[p, j] = (p == ind[j]); gather-as-matmul on the MXU:
    #   pred[c, j] = sum_p feat[c, p] * one_hot[p, j] = feat[c, ind[j]]
    pos = jax.lax.broadcasted_iota(jnp.int32, (hw, k), 0)
    one_hot = (pos == idx).astype(jnp.float32)
    pred = jnp.dot(
        feat, one_hot,
        preferred_element_type=jnp.float32,
        precision=jax.lax.Precision.HIGHEST,
    )  # (C, K)

    # |pred*mask - target*mask| == |pred - target| * mask  (mask is a {0,1} float mask)
    acc_ref[...] += jnp.sum(jnp.abs(pred - tgt) * msk)

    @pl.when(b == pl.num_programs(0) - 1)
    def _finalize():
        o_ref[...] = acc_ref[...] * inv_total


# ----------------------------- wrapper -----------------------------

def l1_loss_pallas(output, mask, ind, target):
    """output: (B, C, H, W) f32; mask: (B, K); ind: (B, K) int; target: (B, K, C) f32."""
    B, C, H, W = output.shape
    K = ind.shape[1]
    HW = H * W

    feat = output.reshape(B, C, HW)                                   # free reshape, stays NCHW
    ind3 = ind.reshape(B, 1, K).astype(jnp.int32)
    mask3 = mask.reshape(B, 1, K).astype(jnp.float32)
    tgt_t = jnp.transpose(target, (0, 2, 1)).astype(jnp.float32)      # (B, C, K), tiny tensor

    total = B * K * C
    kernel = functools.partial(_l1_loss_kernel, inv_total=1.0 / float(total))

    cost = pl.CostEstimate(
        flops=2 * B * C * HW * K + 4 * B * C * K,
        transcendentals=0,
        bytes_accessed=4 * (B * C * HW + 2 * B * K + B * C * K + 1),
    )

    out = pl.pallas_call(
        kernel,
        out_shape=jax.ShapeDtypeStruct((1, 1), jnp.float32),
        grid=(B,),
        in_specs=[
            pl.BlockSpec((1, C, HW), lambda b: (b, 0, 0)),   # feature map slab for batch b
            pl.BlockSpec((1, 1, K), lambda b: (b, 0, 0)),    # gather indices
            pl.BlockSpec((1, 1, K), lambda b: (b, 0, 0)),    # mask
            pl.BlockSpec((1, C, K), lambda b: (b, 0, 0)),    # target (channel-major)
        ],
        out_specs=pl.BlockSpec((1, 1), lambda b: (0, 0)),    # scalar loss, resident across grid
        scratch_shapes=[pltpu.VMEM((1, 1), jnp.float32)],    # running sum of |diff|*mask
        compiler_params=pltpu.CompilerParams(
            dimension_semantics=("arbitrary",),              # sequential: accumulator output
        ),
        cost_estimate=cost,
    )(feat, ind3, mask3, tgt_t)
    return out[0, 0]


# ----------------------------- pure-JAX reference -----------------------------

def l1_loss_ref(output, mask, ind, target):
    B, C, H, W = output.shape
    K = ind.shape[1]
    feat = jnp.transpose(output, (0, 2, 3, 1)).reshape(B, H * W, C)
    gidx = jnp.broadcast_to(ind[:, :, None].astype(jnp.int32), (B, K, C))
    pred = jnp.take_along_axis(feat, gidx, axis=1)                    # (B, K, C)
    m = mask[:, :, None].astype(jnp.float32)
    return jnp.mean(jnp.abs(pred * m - target * m))


# ----------------------------- main -----------------------------

if __name__ == "__main__":
    B, C, H, W, K = 2, 32, 16, 16, 8   # HW = 256 (lane-dense), K objects per image

    key = jax.random.PRNGKey(0)
    k1, k2, k3, k4 = jax.random.split(key, 4)
    output = jax.random.normal(k1, (B, C, H, W), jnp.float32)
    ind = jax.random.randint(k2, (B, K), 0, H * W, jnp.int32)
    mask = (jax.random.uniform(k3, (B, K)) > 0.3).astype(jnp.float32)
    target = jax.random.normal(k4, (B, K, C), jnp.float32)

    loss_fn = jax.jit(l1_loss_pallas)
    loss = jax.block_until_ready(loss_fn(output, mask, ind, target))

    ref = l1_loss_ref(output, mask, ind, target)
    assert loss.shape == ()
    assert bool(jnp.isfinite(loss))
    assert abs(float(loss) - float(ref)) <= 1e-3 + 1e-2 * abs(float(ref)), (
        float(loss), float(ref))

    print("KERNEL_OK")
</pallas_src>

<mosaic_0001>
module attributes {stable_mosaic.version = 11 : i64} {
  func.func @_l1_loss_kernel(%arg0: i32, %arg1: memref<1x32x256xf32, #tpu.memory_space<vmem>>, %arg2: memref<1x1x8xi32, #tpu.memory_space<vmem>>, %arg3: memref<1x1x8xf32, #tpu.memory_space<vmem>>, %arg4: memref<1x32x8xf32, #tpu.memory_space<vmem>>, %arg5: memref<1x1xf32, #tpu.memory_space<vmem>>, %arg6: memref<1x1xf32, #tpu.memory_space<vmem>>) attributes {dimension_semantics = [#tpu.dimension_semantics<arbitrary>], iteration_bounds = array<i64: 2>, scalar_prefetch = 0 : i64, scratch_operands = 1 : i64, tpu.core_type = #tpu.core_type<tc>, window_params = [{transform_indices = @transform_0, window_bounds = array<i64: 1, 32, 256>}, {transform_indices = @transform_1, window_bounds = array<i64: 1, 1, 8>}, {transform_indices = @transform_2, window_bounds = array<i64: 1, 1, 8>}, {transform_indices = @transform_3, window_bounds = array<i64: 1, 32, 8>}, {pipeline_mode = #tpu.pipeline_mode<synchronous>, transform_indices = @transform_4, window_bounds = array<i64: 1, 1>}]} {
    %c0_i32 = arith.constant 0 : i32
    %0 = arith.cmpi eq, %arg0, %c0_i32 : i32
    %1 = arith.extui %0 : i1 to i32
    %c0_i32_0 = arith.constant 0 : i32
    %2 = arith.cmpi ne, %1, %c0_i32_0 : i32
    scf.if %2 {
      %cst_18 = arith.constant 0.000000e+00 : f32
      %32 = vector.broadcast %cst_18 : f32 to vector<1x1xf32>
      %c0_19 = arith.constant 0 : index
      %c0_20 = arith.constant 0 : index
      %33 = vector.load %arg6[%c0_19, %c0_20] : memref<1x1xf32, #tpu.memory_space<vmem>>, vector<1x1xf32>
      tpu.vector_store %arg6[%c0_19, %c0_20], %32 {strides = array<i32>} : memref<1x1xf32, #tpu.memory_space<vmem>>, vector<1x1xf32>,
    } else {
    }
    %c0 = arith.constant 0 : index
    %c0_1 = arith.constant 0 : index
    %c0_2 = arith.constant 0 : index
    %3 = vector.load %arg1[%c0, %c0_1, %c0_2] : memref<1x32x256xf32, #tpu.memory_space<vmem>>, vector<1x32x256xf32>
    %4 = vector.shape_cast %3 : vector<1x32x256xf32> to vector<32x256xf32>
    %c0_3 = arith.constant 0 : index
    %c0_4 = arith.constant 0 : index
    %c0_5 = arith.constant 0 : index
    %5 = vector.load %arg2[%c0_3, %c0_4, %c0_5] : memref<1x1x8xi32, #tpu.memory_space<vmem>>, vector<1x1x8xi32>
    %6 = vector.shape_cast %5 : vector<1x1x8xi32> to vector<1x8xi32>
    %c0_6 = arith.constant 0 : index
    %c0_7 = arith.constant 0 : index
    %c0_8 = arith.constant 0 : index
    %7 = vector.load %arg3[%c0_6, %c0_7, %c0_8] : memref<1x1x8xf32, #tpu.memory_space<vmem>>, vector<1x1x8xf32>
    %8 = vector.shape_cast %7 : vector<1x1x8xf32> to vector<1x8xf32>
    %c0_9 = arith.constant 0 : index
    %c0_10 = arith.constant 0 : index
    %c0_11 = arith.constant 0 : index
    %9 = vector.load %arg4[%c0_9, %c0_10, %c0_11] : memref<1x32x8xf32, #tpu.memory_space<vmem>>, vector<1x32x8xf32>
    %10 = vector.shape_cast %9 : vector<1x32x8xf32> to vector<32x8xf32>
    %11 = tpu.iota {dimensions = array<i32: 0>} : vector<256x8xi32>
    %12 = vector.broadcast %6 : vector<1x8xi32> to vector<256x8xi32>
    %13 = arith.cmpi eq, %11, %12 : vector<256x8xi32>
    %14 = arith.extui %13 : vector<256x8xi1> to vector<256x8xi32>
    %15 = arith.sitofp %14 : vector<256x8xi32> to vector<256x8xf32>
    %cst = arith.constant dense<0.000000e+00> : vector<32x8xf32>
    %16 = tpu.matmul %4, %15, %cst {dimension_numbers = #tpu.dot_dimension_numbers<[1], [0], [0], [1], [0, 0, 1, 1], [], []>, precision = #tpu.contract_precision<fp32>} : vector<32x256xf32>, vector<256x8xf32>, vector<32x8xf32> -> vector<32x8xf32>
    %c0_12 = arith.constant 0 : index
    %c0_13 = arith.constant 0 : index
    %17 = vector.load %arg6[%c0_12, %c0_13] : memref<1x1xf32, #tpu.memory_space<vmem>>, vector<1x1xf32>
    %18 = arith.subf %16, %10 : vector<32x8xf32>
    %19 = math.absf %18 : vector<32x8xf32>
    %20 = vector.broadcast %8 : vector<1x8xf32> to vector<32x8xf32>
    %21 = arith.mulf %19, %20 : vector<32x8xf32>
    %22 = vector.shape_cast %21 : vector<32x8xf32> to vector<1x32x8xf32>
    %cst_14 = arith.constant dense<0.000000e+00> : vector<1xf32>
    %23 = vector.multi_reduction <add>, %22, %cst_14 [1, 2] : vector<1x32x8xf32> to vector<1xf32>
    %24 = vector.shape_cast %23 : vector<1xf32> to vector<1x1x1xf32>
    %25 = vector.extract %24[0, 0, 0] : f32 from vector<1x1x1xf32>
    %26 = vector.broadcast %25 : f32 to vector<1x1xf32>
    %27 = arith.addf %17, %26 : vector<1x1xf32>
    %c0_15 = arith.constant 0 : index
    %c0_16 = arith.constant 0 : index
    %28 = vector.load %arg6[%c0_15, %c0_16] : memref<1x1xf32, #tpu.memory_space<vmem>>, vector<1x1xf32>
    tpu.vector_store %arg6[%c0_15, %c0_16], %27 {strides = array<i32>} : memref<1x1xf32, #tpu.memory_space<vmem>>, vector<1x1xf32>,
    %c1_i32 = arith.constant 1 : i32
    %29 = arith.cmpi eq, %arg0, %c1_i32 : i32
    %30 = arith.extui %29 : i1 to i32
    %c0_i32_17 = arith.constant 0 : i32
    %31 = arith.cmpi ne, %30, %c0_i32_17 : i32
    scf.if %31 {
      %c0_18 = arith.constant 0 : index
      %c0_19 = arith.constant 0 : index
      %32 = vector.load %arg6[%c0_18, %c0_19] : memref<1x1xf32, #tpu.memory_space<vmem>>, vector<1x1xf32>
      %cst_20 = arith.constant 0.001953125 : f32
      %33 = vector.broadcast %cst_20 : f32 to vector<1x1xf32>
      %34 = arith.mulf %32, %33 : vector<1x1xf32>
      %c0_21 = arith.constant 0 : index
      %c0_22 = arith.constant 0 : index
      %35 = vector.load %arg5[%c0_21, %c0_22] : memref<1x1xf32, #tpu.memory_space<vmem>>, vector<1x1xf32>
      tpu.vector_store %arg5[%c0_21, %c0_22], %34 {strides = array<i32>} : memref<1x1xf32, #tpu.memory_space<vmem>>, vector<1x1xf32>,
    } else {
    }
    return
  }
  func.func @transform_0(%arg0: i32) -> (i32, i32, i32) {
    %c0_i32 = arith.constant 0 : i32
    %c0_i32_0 = arith.constant 0 : i32
    %c0_i32_1 = arith.constant 0 : i32
    return %arg0, %c0_i32, %c0_i32_0 : i32, i32, i32
  }
  func.func @transform_1(%arg0: i32) -> (i32, i32, i32) {
    %c0_i32 = arith.constant 0 : i32
    %c0_i32_0 = arith.constant 0 : i32
    %c0_i32_1 = arith.constant 0 : i32
    return %arg0, %c0_i32, %c0_i32_0 : i32, i32, i32
  }
  func.func @transform_2(%arg0: i32) -> (i32, i32, i32) {
    %c0_i32 = arith.constant 0 : i32
    %c0_i32_0 = arith.constant 0 : i32
    %c0_i32_1 = arith.constant 0 : i32
    return %arg0, %c0_i32, %c0_i32_0 : i32, i32, i32
  }
  func.func @transform_3(%arg0: i32) -> (i32, i32, i32) {
    %c0_i32 = arith.constant 0 : i32
    %c0_i32_0 = arith.constant 0 : i32
    %c0_i32_1 = arith.constant 0 : i32
    return %arg0, %c0_i32, %c0_i32_0 : i32, i32, i32
  }
  func.func @transform_4(%arg0: i32) -> (i32, i32) {
    %c0_i32 = arith.constant 0 : i32
    %c0_i32_0 = arith.constant 0 : i32
    %c0_i32_1 = arith.constant 0 : i32
    return %c0_i32, %c0_i32_0 : i32, i32
  }
}

</mosaic_0001>

<bundles_post_ra>
// kernel: l1_loss_pallas.1
= control target key start
LH: loop header
LB: loop body
LE: loop exit
PB: predicated region body
PF: predicated region fallthrough
CT: control target
= control target key end

     0   :  { %9 = vsyncpa [#allocation4], 0  ;;  %s1607_s15 = smov 0   ;;  %s2760_s0 = inlined_call_operand.vmem [shape: f32[2,32,256], index: 0, kind: input, shape index: {}]   ;;  %s2761_s1 = inlined_call_operand.vmem [shape: s32[2,1,8], index: 1, kind: input, shape index: {}]   ;;  %s2762_s2 = inlined_call_operand.vmem [shape: f32[2,1,8], index: 2, kind: input, shape index: {}]   ;;  %s2763_s3 = inlined_call_operand.vmem [shape: f32[2,32,8], index: 3, kind: input, shape index: {}]   ;;  %s2764_s4 = inlined_call_operand.hbm [shape: f32[1,1], index: 4, kind: output, shape index: {}]  }
   0x1 LB: > { %s1613_s16 = sadd.s32 4294967295, %s1576_s15   ;;  %p1375_p0 = scmp.ge.s32.totalorder %s1576_s15, 1  ;;  %s1576_s15 = sphi %s1607_s15, %s15_s15  }
   0x2   : > { %p184_p1 = scmp.lt.s32.totalorder %s1576_s15, 3 }
   0x4   : > { %p185_p2 = pnand %p1375_p0, %p184_p1 }
   0x6   : > { %188 = sbr.rel (%p185_p2) target bundleno = 509 (0x1fd), region = 36 }
   0xb   : > { %p216_p3 = scmp.lt.s32.totalorder %s1613_s16, 1  ;;  %p1380_p4 = scmp.ne.s32.totalorder %s1613_s16, 0 }
   0xd   : > { %s1619_s17 = scalar_select %p216_p3, %s1613_s16, 1 }
   0xe   : > { %235 = sbr.rel (%p1380_p4) target bundleno = 21 (0x15), region = 40 }
   0xf   : > { %s1514_s18 = sshll.u32 %s1619_s17, 6  ;;  %s223_s21 = scalar_lea.vmem %s2761_s1, %s1619_s17 }
  0x10   : > { %s1629_s24 = scalar_lea.vmem %s2760_s0, %s1514_s18  ;;  %s226_s27 = scalar_lea.vmem %s2762_s2, %s1619_s17 }
  0x11   : > { %s1515_s28 = sshll.u32 %s1619_s17, 5 }
  0x12   : > { %s1639_s5 = scalar_lea.vmem %s2763_s3, %s1515_s28 }
  0x13   : > { %vm236_vm0 = vcmask 0   ;;  %v1578_v0 = vmov 0.0  }
  0x14   : > { %237 = vst.msk [vmem:[#allocation2] sm:$0x1] %vm236_vm0, %v1578_v0 }
  0x15 PF: > { %v252_v1 = vlaneseq  ;;  %v1644_v3 = vld [vmem:[%s223_s21] ss:$0 sm:$0xff]  ;;  %v2782_v12 = vmov 1.0   ;;  %v2799_v13 = vmov 0.0   ;;  %p1509_p5 = scmp.ne.s32.totalorder %s1613_s16, 1 }
  0x16   : > { %v1735_v26 = vld [vmem:[%s1629_s24] sm:$0xff] }
  0x17   : > { %v1642_v2 = vshrl.u32 %v252_v1, 7  ;;  %v1783_v38 = vand.u32 4294901760, %v1735_v26 }
  0x19   : > { %v1647_v4 = vadd.s32 120, %v1642_v2  ;;  %v1650_v5 = vadd.s32 112, %v1642_v2  ;;  %v1653_v6 = vadd.s32 104, %v1642_v2  ;;  %v1656_v7 = vadd.s32 96, %v1642_v2 }
  0x1a   : > { %v1659_v8 = vadd.s32 88, %v1642_v2  ;;  %v1662_v9 = vadd.s32 80, %v1642_v2  ;;  %v1665_v10 = vadd.s32 72, %v1642_v2  ;;  %v1668_v11 = vadd.s32 64, %v1642_v2 }
  0x1b   : > { %vm301_vm1 = vcmp.eq.s32.totalorder %v1647_v4, %v1644_v3  ;;  %vm300_vm2 = vcmp.eq.s32.totalorder %v1650_v5, %v1644_v3  ;;  %vm299_vm3 = vcmp.eq.s32.totalorder %v1653_v6, %v1644_v3  ;;  %vm298_vm4 = vcmp.eq.s32.totalorder %v1656_v7, %v1644_v3 }
  0x1c   : > { %1413 = vmatpush.msk.msra.mxu0 %vm301_vm1, %v2782_v12  ;;  %v1396_v14 = vsel %vm301_vm1, 1.0, %v2799_v13  ;;  %v1395_v15 = vsel %vm300_vm2, 1.0, %v2799_v13  ;;  %1429 = vmatpush.msk.msra.mxu3 %vm301_vm1, %v2782_v12  ;;  %vm297_vm5 = vcmp.eq.s32.totalorder %v1659_v8, %v1644_v3  ;;  %v1394_v16 = vsel %vm299_vm3, 1.0, %v2799_v13  ;;  %v239_v8 = vld [vmem:[%s1629_s24 + $0x8] sm:$0xff] }
  0x1d   : > { %v1700_v17 = vsub.f32 %v1396_v14, %v1396_v14  ;;  %v1702_v18 = vsub.f32 %v1395_v15, %v1395_v15  ;;  %v1704_v19 = vsub.f32 %v1394_v16, %v1394_v16  ;;  %vm296_vm6 = vcmp.eq.s32.totalorder %v1662_v9, %v1644_v3 }
  0x1e   : > { %1414 = vmatpush.msk.msra.mxu0 %vm300_vm2, %v2782_v12  ;;  %1430 = vmatpush.msk.msra.mxu3 %vm300_vm2, %v2782_v12  ;;  %v1393_v20 = vsel %vm298_vm4, 1.0, %v2799_v13  ;;  %vm295_vm7 = vcmp.eq.s32.totalorder %v1665_v10, %v1644_v3  ;;  %v1392_v21 = vsel %vm297_vm5, 1.0, %v2799_v13  ;;  %vm294_vm8 = vcmp.eq.s32.totalorder %v1668_v11, %v1644_v3 }
  0x1f   : > { %562 = vmatpush.msra.mxu2 %v1700_v17  ;;  %v449_v22 = vand.u32 4294901760, %v1700_v17  ;;  %v455_v23 = vand.u32 4294901760, %v1702_v18  ;;  %v1731_v24 = vsub.f32 %v1393_v20, %v1393_v20  ;;  %v2788_v25 = vand.u32 4294901760, %v1704_v19 }
  0x20   : > { %1415 = vmatpush.msk.msra.mxu0 %vm299_vm3, %v2782_v12  ;;  %1431 = vmatpush.msk.msra.mxu3 %vm299_vm3, %v2782_v12  ;;  %v1745_v27 = vsub.f32 %v1392_v21, %v1392_v21  ;;  %v1391_v28 = vsel %vm296_vm6, 1.0, %v2799_v13  ;;  %v1752_v29 = vadd.s32 56, %v1642_v2  ;;  %v1390_v30 = vsel %vm295_vm7, 1.0, %v2799_v13 }
  0x21   : > { %565 = vmatpush.msra.mxu2 %v1702_v18  ;;  %v450_v31 = vsub.f32 %v1700_v17, %v449_v22  ;;  %v456_v32 = vsub.f32 %v1702_v18, %v455_v23  ;;  %v462_v33 = vsub.f32 %v1704_v19, %v2788_v25  ;;  %v2781_v34 = vand.u32 4294901760, %v1731_v24 }
  0x22   : > { %1416 = vmatpush.msk.msra.mxu0 %vm298_vm4, %v2782_v12  ;;  %1432 = vmatpush.msk.msra.mxu3 %vm298_vm4, %v2782_v12  ;;  %v1777_v35 = vsub.f32 %v1391_v28, %v1391_v28  ;;  %v2780_v36 = vand.u32 4294901760, %v1745_v27  ;;  %v1780_v37 = vsub.f32 %v1390_v30, %v1390_v30  ;;  %vm2791_vm9 = vcmp.eq.s32.totalorder %v1752_v29, %v1644_v3 }
  0x23   : > { %v451_v39 = vand.u32 4294901760, %v450_v31  ;;  %568 = vmatpush.msra.mxu2 %v1704_v19  ;;  %v457_v40 = vand.u32 4294901760, %v456_v32  ;;  %v468_v41 = vsub.f32 %v1731_v24, %v2781_v34  ;;  %v1803_v43 = vadd.s32 48, %v1642_v2 }
  0x24   : > { %1417 = vmatpush.msk.msra.mxu0 %vm297_vm5, %v2782_v12  ;;  %1433 = vmatpush.msk.msra.mxu3 %vm297_vm5, %v2782_v12  ;;  %v474_v42 = vsub.f32 %v1745_v27, %v2780_v36  ;;  %v2777_v44 = vand.u32 4294901760, %v1777_v35  ;;  %v1389_v45 = vsel %vm294_vm8, 1.0, %v2799_v13  ;;  %v463_v46 = vand.u32 4294901760, %v462_v33  ;;  %v242_v36 = vld [vmem:[%s1629_s24 + $0x20] sm:$0xff] }
  0x25   : > { %452 = vmatpush.msra.mxu1 %v451_v39  ;;  %571 = vmatpush.msra.mxu2 %v1731_v24  ;;  %v1811_v47 = vsub.f32 %v1389_v45, %v1389_v45  ;;  %v1814_v48 = vadd.s32 40, %v1642_v2  ;;  %v2776_v49 = vand.u32 4294901760, %v1780_v37  ;;  %v469_v50 = vand.u32 4294901760, %v468_v41 }
  0x26   : > { %1418 = vmatpush.msk.msra.mxu0 %vm296_vm6, %v2782_v12  ;;  %1434 = vmatpush.msk.msra.mxu3 %vm296_vm6, %v2782_v12  ;;  %vm2790_vm10 = vcmp.eq.s32.totalorder %v1803_v43, %v1644_v3  ;;  %v480_v51 = vsub.f32 %v1777_v35, %v2777_v44  ;;  %v1388_v52 = vsel %vm2791_vm9, 1.0, %v2799_v13  ;;  %v475_v53 = vand.u32 4294901760, %v474_v42 }
  0x27   : > { %458 = vmatpush.msra.mxu1 %v457_v40  ;;  %574 = vmatpush.msra.mxu2 %v1745_v27  ;;  %vm2787_vm11 = vcmp.eq.s32.totalorder %v1814_v48, %v1644_v3  ;;  %v1837_v54 = vsub.f32 %v1388_v52, %v1388_v52  ;;  %v1840_v55 = vadd.s32 32, %v1642_v2  ;;  %v486_v56 = vsub.f32 %v1780_v37, %v2776_v49 }
  0x28   : > { %1419 = vmatpush.msk.msra.mxu0 %vm295_vm7, %v2782_v12  ;;  %1435 = vmatpush.msk.msra.mxu3 %vm295_vm7, %v2782_v12  ;;  %v2774_v57 = vand.u32 4294901760, %v1811_v47  ;;  %v1387_v58 = vsel %vm2790_vm10, 1.0, %v2799_v13  ;;  %v1859_v59 = vadd.s32 24, %v1642_v2  ;;  %v481_v60 = vand.u32 4294901760, %v480_v51 }
  0x29   : > { %464 = vmatpush.msra.mxu1 %v463_v46  ;;  %577 = vmatpush.msra.mxu2 %v1777_v35  ;;  %vm2768_vm12 = vcmp.eq.s32.totalorder %v1840_v55, %v1644_v3  ;;  %v1864_v61 = vsub.f32 %v1387_v58, %v1387_v58  ;;  %v2772_v62 = vand.u32 4294901760, %v1837_v54  ;;  %v1386_v0 = vsel %vm2787_vm11, 1.0, %v2799_v13 }
  0x2a   : > { %1420 = vmatpush.msk.msra.mxu0 %vm294_vm8, %v2782_v12  ;;  %1436 = vmatpush.msk.msra.mxu3 %vm294_vm8, %v2782_v12  ;;  %v492_v63 = vsub.f32 %v1811_v47, %v2774_v57  ;;  %vm2769_vm13 = vcmp.eq.s32.totalorder %v1859_v59, %v1644_v3  ;;  %v1885_v1 = vadd.s32 16, %v1642_v2  ;;  %v1891_v15 = vsub.f32 %v1386_v0, %v1386_v0 }
  0x2b   : > { %470 = vmatpush.msra.mxu1 %v469_v50  ;;  %580 = vmatpush.msra.mxu2 %v1780_v37  ;;  %v498_v14 = vsub.f32 %v1837_v54, %v2772_v62  ;;  %v2771_v16 = vand.u32 4294901760, %v1864_v61  ;;  %v1385_v20 = vsel %vm2768_vm12, 1.0, %v2799_v13  ;;  %v1911_v28 = vadd.s32 8, %v1642_v2 }
  0x2c   : > { %1421 = vmatpush.msk.msra.mxu0 %vm2791_vm9, %v2782_v12  ;;  %1437 = vmatpush.msk.msra.mxu3 %vm2791_vm9, %v2782_v12  ;;  %vm2778_vm14 = vcmp.eq.s32.totalorder %v1885_v1, %v1644_v3  ;;  %v1908_v21 = vsub.f32 %v1385_v20, %v1385_v20  ;;  %v487_v30 = vand.u32 4294901760, %v486_v56  ;;  %v2767_v32 = vand.u32 4294901760, %v1891_v15 }
  0x2d   : > { %476 = vmatpush.msra.mxu1 %v475_v53  ;;  %583 = vmatpush.msra.mxu2 %v1811_v47  ;;  %v504_v31 = vsub.f32 %v1864_v61, %v2771_v16  ;;  %v1384_v33 = vsel %vm2769_vm13, 1.0, %v2799_v13  ;;  %vm2775_vm15 = vcmp.eq.s32.totalorder %v1911_v28, %v1644_v3  ;;  %vm2784_vm0 = vcmp.eq.s32.totalorder %v1642_v2, %v1644_v3 }
  0x2e   : > { %1422 = vmatpush.msk.msra.mxu0 %vm2790_vm10, %v2782_v12  ;;  %1438 = vmatpush.msk.msra.mxu3 %vm2790_vm10, %v2782_v12  ;;  %v1932_v39 = vsub.f32 %v1384_v33, %v1384_v33  ;;  %v2766_v40 = vand.u32 4294901760, %v1908_v21  ;;  %v493_v41 = vand.u32 4294901760, %v492_v63  ;;  %v499_v42 = vand.u32 4294901760, %v498_v14  ;;  %v240_v63 = vld [vmem:[%s1629_s24 + $0x10] sm:$0xff] }
  0x2f   : > { %482 = vmatpush.msra.mxu1 %v481_v60  ;;  %586 = vmatpush.msra.mxu2 %v1837_v54  ;;  %v1940_v45 = vsub.f32 %v1735_v26, %v1783_v38  ;;  %v1383_v46 = vsel %vm2778_vm14, 1.0, %v2799_v13  ;;  %v510_v26 = vsub.f32 %v1891_v15, %v2767_v32  ;;  %v1382_v52 = vsel %vm2775_vm15, 1.0, %v2799_v13 }
  0x30   : > { %1423 = vmatpush.msk.msra.mxu0 %vm2787_vm11, %v2782_v12  ;;  %1439 = vmatpush.msk.msra.mxu3 %vm2787_vm11, %v2782_v12  ;;  %v1957_v50 = vsub.f32 %v1383_v46, %v1383_v46  ;;  %v2765_v51 = vand.u32 4294901760, %v1932_v39  ;;  %v516_v56 = vsub.f32 %v1908_v21, %v2766_v40  ;;  %v1969_v58 = vsub.f32 %v1382_v52, %v1382_v52 }
  0x31   : > { %488 = vmatpush.msra.mxu1 %v487_v30  ;;  %589 = vmatpush.msra.mxu2 %v1864_v61  ;;  %v416_v53 = vand.u32 4294901760, %v1940_v45  ;;  %v1381_v60 = vsel %vm2784_vm0, 1.0, %v2799_v13  ;;  %v505_v0 = vand.u32 4294901760, %v504_v31  ;;  %v1997_v33 = vadd.s32 248, %v1642_v2 }
  0x32   : > { %1424 = vmatpush.msk.msra.mxu0 %vm2768_vm12, %v2782_v12  ;;  %1440 = vmatpush.msk.msra.mxu3 %vm2768_vm12, %v2782_v12  ;;  %v1987_v14 = vsub.f32 %v1932_v39, %v2765_v51  ;;  %v2770_v20 = vand.u32 4294901760, %v1957_v50  ;;  %v1990_v30 = vsub.f32 %v1381_v60, %v1381_v60  ;;  %v2773_v46 = vand.u32 4294901760, %v1969_v58 }
  0x33   : > { %494 = vmatpush.msra.mxu1 %v493_v41  ;;  %592 = vmatpush.msra.mxu2 %v1891_v15  ;;  %v417_v31 = vsub.f32 %v1940_v45, %v416_v53  ;;  %v2001_v52 = vadd.s32 240, %v1642_v2  ;;  %v511_v41 = vand.u32 4294901760, %v510_v26  ;;  %v2016_v51 = vand.u32 4294901760, %v240_v63 }
  0x34   : > { %1425 = vmatpush.msk.msra.mxu0 %vm2769_vm13, %v2782_v12  ;;  %1441 = vmatpush.msk.msra.mxu3 %vm2769_vm13, %v2782_v12  ;;  %v2014_v60 = vsub.f32 %v1957_v50, %v2770_v20  ;;  %v2779_v40 = vand.u32 4294901760, %v1990_v30  ;;  %v517_v32 = vand.u32 4294901760, %v516_v56  ;;  %v523_v26 = vand.u32 4294901760, %v1987_v14 }
  0x35   : > { %2807 = vst [vmem:[#allocation6_spill] sm:$0xff] %v2001_v52  ;;  %500 = vmatpush.msra.mxu1 %v499_v42  ;;  %595 = vmatpush.msra.mxu2 %v1908_v21  ;;  %vm2797_vm12 = vcmp.eq.s32.totalorder %v1997_v33, %v1644_v3  ;;  %vm2796_vm13 = vcmp.eq.s32.totalorder %v2001_v52, %v1644_v3  ;;  %v418_v20 = vand.u32 4294901760, %v417_v31  ;;  %v2050_v62 = vadd.s32 232, %v1642_v2 }
  0x36   : > { %1426 = vmatpush.msk.msra.mxu0 %vm2778_vm14, %v2782_v12  ;;  %1442 = vmatpush.msk.msra.mxu3 %vm2778_vm14, %v2782_v12  ;;  %v2036_v42 = vsub.f32 %v1969_v58, %v2773_v46  ;;  %v1412_v56 = vsel %vm2797_vm12, 1.0, %v2799_v13  ;;  %v2043_v14 = vsub.f32 %v240_v63, %v2016_v51  ;;  %v529_v31 = vand.u32 4294901760, %v2014_v60 }
  0x37   : > { %506 = vmatpush.msra.mxu1 %v505_v0  ;;  %598 = vmatpush.msra.mxu2 %v1932_v39  ;;  %v2047_v16 = vsub.f32 %v1412_v56, %v1412_v56  ;;  %v1411_v46 = vsel %vm2796_vm13, 1.0, %v2799_v13  ;;  %v2068_v0 = vsub.f32 %v1990_v30, %v2779_v40  ;;  %v2073_v56 = vadd.s32 224, %v1642_v2 }
  0x38   : > { %1427 = vmatpush.msk.msra.mxu0 %vm2775_vm15, %v2782_v12  ;;  %1443 = vmatpush.msk.msra.mxu3 %vm2775_vm15, %v2782_v12  ;;  %v2785_v63 = vand.u32 4294901760, %v2043_v14  ;;  %v2070_v60 = vsub.f32 %v1411_v46, %v1411_v46  ;;  %vm315_vm15 = vcmp.eq.s32.totalorder %v2050_v62, %v1644_v3  ;;  %v2080_v49 = vadd.s32 216, %v1642_v2 }
  0x39   : > { %512 = vmatpush.msra.mxu1 %v511_v41  ;;  %601 = vmatpush.msra.mxu2 %v1957_v50  ;;  %v2786_v57 = vand.u32 4294901760, %v2047_v16  ;;  %v2083_v44 = vadd.s32 208, %v1642_v2  ;;  %vm314_vm14 = vcmp.eq.s32.totalorder %v2073_v56, %v1644_v3  ;;  %v1410_v40 = vsel %vm315_vm15, 1.0, %v2799_v13 }
  0x3a   : > { %2808 = vst [vmem:[#allocation7_spill] sm:$0xff] %v2080_v49  ;;  %1428 = vmatpush.msk.msra.mxu0 %vm2784_vm0, %v2782_v12  ;;  %1444 = vmatpush.msk.msra.mxu3 %vm2784_vm0, %v2782_v12  ;;  %v425_v46 = vsub.f32 %v2043_v14, %v2785_v63  ;;  %v2789_v41 = vand.u32 4294901760, %v2070_v60  ;;  %v2107_v12 = vsub.f32 %v1410_v40, %v1410_v40  ;;  %v1409_v63 = vsel %vm314_vm14, 1.0, %v2799_v13 }
  0x3b   : > { %419 = vmatmul.f32.vlgmr.msra.gmra.mxu0 %v418_v20  ;;  %518 = vmatpush.msra.mxu1 %v517_v32  ;;  %v884_v34 = vsub.f32 %v2047_v16, %v2786_v57  ;;  %vm313_vm0 = vcmp.eq.s32.totalorder %v2080_v49, %v1644_v3  ;;  %v535_v32 = vand.u32 4294901760, %v2036_v42  ;;  %v541_v20 = vand.u32 4294901760, %v2068_v0 }
  0x3c   : > { %689 = vmatpush.msrb.mxu0 %v449_v22  ;;  %604 = vmatpush.msra.mxu2 %v1969_v58  ;;  %v2120_v57 = vsub.f32 %v1409_v63, %v1409_v63  ;;  %vm312_vm11 = vcmp.eq.s32.totalorder %v2083_v44, %v1644_v3  ;;  %v2792_v25 = vand.u32 4294901760, %v2107_v12  ;;  %v1408_v17 = vsel %vm313_vm0, 1.0, %v2799_v13 }
  0x3d   : > { %524 = vmatpush.msra.mxu1 %v523_v26  ;;  %664 = vmatmul.f32.vlgmr.msra.gmra.mxu3 %v416_v53  ;;  %v885_v40 = vand.u32 4294901760, %v884_v34  ;;  %v2131_v22 = vand.u32 4294901760, %v242_v36  ;;  %v890_v26 = vsub.f32 %v2070_v60, %v2789_v41  ;;  %v2140_v53 = vsub.f32 %v1408_v17, %v1408_v17 }
  0x3e   : > { %693 = vmatpush.msrb.mxu0 %v455_v23  ;;  %607 = vmatpush.msra.mxu2 %v1990_v30  ;;  %v2793_v34 = vand.u32 4294901760, %v2120_v57  ;;  %v2143_v42 = vadd.s32 200, %v1642_v2  ;;  %v426_v63 = vand.u32 4294901760, %v425_v46  ;;  %v1407_v23 = vsel %vm312_vm11, 1.0, %v2799_v13 }
  0x3f   : > { %530 = vmatpush.msra.mxu1 %v529_v31  ;;  %610 = vmatmul.f32.vlgmr.msra.gmra.mxu2 %v1940_v45  ;;  %v2147_v18 = vsub.f32 %v242_v36, %v2131_v22  ;;  %v2154_v0 = vadd.s32 192, %v1642_v2  ;;  %v2810_v17 = vand.u32 4294901760, %v1704_v19  ;;  %v2811_v41 = vmov 1.0   ;;  %v244_v19 = vld [vmem:[%s1629_s24 + $0x30] sm:$0xff] }
  0x40   : > { %2809 = vst [vmem:[#allocation8_spill] sm:$0xff] %v2143_v42  ;;  %1461 = vmatpush.msk.msrb.mxu2 %vm2797_vm12, %v2811_v41  ;;  %v896_v36 = vsub.f32 %v2107_v12, %v2792_v25  ;;  %v2798_v45 = vand.u32 4294901760, %v2140_v53  ;;  %vm2806_vm10 = vcmp.eq.s32.totalorder %v2143_v42, %v1644_v3  ;;  %v2168_v31 = vsub.f32 %v1407_v23, %v1407_v23 }
  0x41   : > { %697 = vmatpush.msrb.mxu0 %v2810_v17  ;;  %536 = vmatpush.msra.mxu1 %v535_v32  ;;  %vm310_vm9 = vcmp.eq.s32.totalorder %v2154_v0, %v1644_v3  ;;  %v1406_v46 = vsel %vm2806_vm10, 1.0, %v2799_v13  ;;  %v2812_v17 = vand.u32 4294901760, %v1731_v24  ;;  %v891_v32 = vand.u32 4294901760, %v890_v26 }
  0x42   : > { %886 = vmatpush.msrb.mxu3 %v885_v40  ;;  %1462 = vmatpush.msk.msrb.mxu2 %vm2796_vm13, %v2811_v41  ;;  %v902_v40 = vsub.f32 %v2120_v57, %v2793_v34  ;;  %v2187_v25 = vsub.f32 %v1406_v46, %v1406_v46  ;;  %v2191_v24 = vadd.s32 184, %v1642_v2  ;;  %v2198_v26 = vadd.s32 176, %v1642_v2 }
  0x43   : > { %701 = vmatpush.msrb.mxu0 %v2812_v17  ;;  %542 = vmatpush.msra.mxu1 %v541_v20  ;;  %v1405_v17 = vsel %vm310_vm9, 1.0, %v2799_v13  ;;  %v2813_v34 = vand.u32 4294901760, %v1745_v27  ;;  %v897_v46 = vand.u32 4294901760, %v896_v36  ;;  %v908_v20 = vsub.f32 %v2140_v53, %v2798_v45 }
  0x44   : > { %427 = vmatmul.f32.gmra.mxu0 %v426_v63  ;;  %544 = vmatmul.f32.vlgmr.msra.gmra.mxu1 %v1783_v38  ;;  %v2814_v63 = vand.u32 4294901760, %v2147_v18  ;;  %v2209_v52 = vsub.f32 %v1405_v17, %v1405_v17  ;;  %vm309_vm13 = vcmp.eq.s32.totalorder %v2191_v24, %v1644_v3  ;;  %vm308_vm12 = vcmp.eq.s32.totalorder %v2198_v26, %v1644_v3 }
  0x45   : > { %705 = vmatpush.msrb.mxu0 %v2813_v34  ;;  %1445 = vmatpush.msk.msrb.mxu1 %vm301_vm1, %v2811_v41  ;;  %v2224_v34 = vand.u32 4294901760, %v244_v19  ;;  %v2815_v36 = vand.u32 4294901760, %v1777_v35  ;;  %v903_v4 = vand.u32 4294901760, %v902_v40  ;;  %v2816_v17 = vand.u32 4294901760, %v2168_v31 }
  0x46   : > { %v433_v23 = vsub.f32 %v2147_v18, %v2814_v63  ;;  %1463 = vmatpush.msk.msrb.mxu2 %vm315_vm15, %v2811_v41  ;;  %892 = vmatpush.msrb.mxu3 %v891_v32  ;;  %v1404_v45 = vsel %vm309_vm13, 1.0, %v2799_v13  ;;  %v2249_v40 = vadd.s32 168, %v1642_v2  ;;  %v909_v5 = vand.u32 4294901760, %v908_v20 }
  0x47   : > { %709 = vmatpush.msrb.mxu0 %v2815_v36  ;;  %v914_v63 = vsub.f32 %v2168_v31, %v2816_v17  ;;  %1446 = vmatpush.msk.msrb.mxu1 %vm300_vm2, %v2811_v41  ;;  %v2243_v35 = vsub.f32 %v1404_v45, %v1404_v45  ;;  %v2246_v32 = vsub.f32 %v244_v19, %v2224_v34  ;;  %v1403_v36 = vsel %vm308_vm12, 1.0, %v2799_v13 }
  0x48   : > { %1464 = vmatpush.msk.msrb.mxu2 %vm314_vm14, %v2811_v41  ;;  %898 = vmatpush.msrb.mxu3 %v897_v46  ;;  %v2258_v45 = vadd.s32 160, %v1642_v2  ;;  %v2817_v19 = vand.u32 4294901760, %v1780_v37  ;;  %v434_v27 = vand.u32 4294901760, %v433_v23  ;;  %v2818_v13 = vand.u32 4294901760, %v2187_v25 }
  0x49   : > { %615 = vmatmul.f32.gmra.mxu2 %v2043_v14  ;;  %1447 = vmatpush.msk.msrb.mxu1 %vm299_vm3, %v2811_v41  ;;  %vm307_vm1 = vcmp.eq.s32.totalorder %v2249_v40, %v1644_v3  ;;  %v2272_v20 = vadd.s32 152, %v1642_v2  ;;  %v2278_v37 = vsub.f32 %v1403_v36, %v1403_v36  ;;  %v2819_v6 = vmov 0.0  }
  0x4a   : > { %713 = vmatpush.msrb.mxu0 %v2817_v19  ;;  %v920_v46 = vsub.f32 %v2187_v25, %v2818_v13  ;;  %1465 = vmatpush.msk.msrb.mxu2 %vm313_vm0, %v2811_v41  ;;  %vm306_vm2 = vcmp.eq.s32.totalorder %v2258_v45, %v1644_v3  ;;  %v1402_v13 = vsel %vm307_vm1, 1.0, %v2819_v6  ;;  %v2820_v23 = vand.u32 4294901760, %v2043_v14 }
  0x4b   : > { %904 = vmatpush.msrb.mxu3 %v903_v4  ;;  %v2821_v19 = vand.u32 4294901760, %v1811_v47  ;;  %v915_v17 = vand.u32 4294901760, %v914_v63  ;;  %v2805_v49 = vand.u32 4294901760, %v2243_v35  ;;  %v1401_v36 = vsel %vm306_vm2, 1.0, %v2819_v6  ;;  %1448 = vmatpush.msk.msrb.mxu1 %vm298_vm4, %v2811_v41 }
  0x4c   : > { %670 = vmatmul.f32.gmra.mxu3 %v2820_v23  ;;  %1466 = vmatpush.msk.msrb.mxu2 %vm312_vm11, %v2811_v41  ;;  %v2822_v47 = vand.u32 4294901760, %v2209_v52  ;;  %v2307_v63 = vsub.f32 %v1402_v13, %v1402_v13  ;;  %vm305_vm3 = vcmp.eq.s32.totalorder %v2272_v20, %v1644_v3  ;;  %v2312_v23 = vadd.s32 144, %v1642_v2 }
  0x4d   : > { %717 = vmatpush.msrb.mxu0 %v2821_v19  ;;  %910 = vmatpush.msrb.mxu3 %v909_v5  ;;  %v921_v7 = vand.u32 4294901760, %v920_v46  ;;  %v2823_v19 = vand.u32 4294901760, %v1837_v54  ;;  %v1400_v13 = vsel %vm305_vm3, 1.0, %v2819_v6  ;;  %v932_v54 = vsub.f32 %v2243_v35, %v2805_v49 }
  0x4e   : > { %v926_v14 = vsub.f32 %v2209_v52, %v2822_v47  ;;  %435 = vmatmul.f32.gmra.mxu0 %v434_v27  ;;  %548 = vmatmul.f32.gmra.mxu1 %v2016_v51  ;;  %v2318_v47 = vsub.f32 %v1401_v36, %v1401_v36  ;;  %vm304_vm4 = vcmp.eq.s32.totalorder %v2312_v23, %v1644_v3  ;;  %v2824_v27 = vand.u32 4294901760, %v2246_v32 }
  0x4f   : > { %721 = vmatpush.msrb.mxu0 %v2823_v19  ;;  %1449 = vmatpush.msk.msrb.mxu1 %vm297_vm5, %v2811_v41  ;;  %v2341_v46 = vadd.s32 136, %v1642_v2  ;;  %v2344_v36 = vadd.s32 128, %v1642_v2  ;;  %v2825_v19 = vand.u32 4294901760, %v1864_v61  ;;  %v1399_v49 = vsel %vm304_vm4, 1.0, %v2819_v6 }
  0x50   : > { %1467 = vmatpush.msk.msrb.mxu2 %vm2806_vm10, %v2811_v41  ;;  %v441_v5 = vsub.f32 %v2246_v32, %v2824_v27  ;;  %916 = vmatpush.msrb.mxu3 %v915_v17  ;;  %v927_v4 = vand.u32 4294901760, %v926_v14  ;;  %v2362_v61 = vsub.f32 %v1400_v13, %v1400_v13  ;;  %v2826_v17 = vand.u32 4294901760, %v2278_v37 }
  0x51   : > { %725 = vmatpush.msrb.mxu0 %v2825_v19  ;;  %1450 = vmatpush.msk.msrb.mxu1 %vm296_vm6, %v2811_v41  ;;  %vm303_vm5 = vcmp.eq.s32.totalorder %v2341_v46, %v1644_v3  ;;  %vm302_vm10 = vcmp.eq.s32.totalorder %v2344_v36, %v1644_v3  ;;  %v2377_v27 = vand.u32 4294901760, %v239_v8  ;;  %v2827_v19 = vand.u32 4294901760, %v1891_v15 }
  0x52   : > { %1468 = vmatpush.msk.msrb.mxu2 %vm310_vm9, %v2811_v41  ;;  %922 = vmatpush.msrb.mxu3 %v921_v7  ;;  %v938_v9 = vsub.f32 %v2278_v37, %v2826_v17  ;;  %v1398_v13 = vsel %vm303_vm5, 1.0, %v2819_v6  ;;  %v933_v7 = vand.u32 4294901760, %v932_v54  ;;  %v442_v42 = vand.u32 4294901760, %v441_v5 }
  0x53   : > { %620 = vmatmul.f32.gmra.mxu2 %v2147_v18  ;;  %729 = vmatpush.msrb.mxu0 %v2827_v19  ;;  %v2385_v17 = vsub.f32 %v1399_v49, %v1399_v49  ;;  %v1397_v14 = vsel %vm302_vm10, 1.0, %v2819_v6  ;;  %v2828_v15 = vand.u32 4294901760, %v2307_v63  ;;  %v2829_v54 = vand.u32 4294901760, %v2147_v18 }
  0x54   : > { %1451 = vmatpush.msk.msrb.mxu1 %vm295_vm7, %v2811_v41  ;;  %1469 = vmatpush.msk.msrb.mxu2 %vm309_vm13, %v2811_v41  ;;  %v2830_v49 = vand.u32 4294901760, %v1908_v21  ;;  %v955_v5 = vand.u32 4294901760, %v2362_v61  ;;  %v2403_v19 = vsub.f32 %v1398_v13, %v1398_v13  ;;  %v939_v18 = vand.u32 4294901760, %v938_v9  ;;  %v241_v9 = vld [vmem:[%s1629_s24 + $0x18] sm:$0xff] }
  0x55   : > { %928 = vmatpush.msrb.mxu3 %v927_v4  ;;  %v944_v10 = vsub.f32 %v2307_v63, %v2828_v15  ;;  %v2831_v6 = vand.u32 4294901760, %v2318_v47  ;;  %v2417_v4 = vsub.f32 %v239_v8, %v2377_v27  ;;  %v961_v13 = vand.u32 4294901760, %v2385_v17 }
  0x56   : > { %676 = vmatmul.f32.gmra.mxu3 %v2829_v54  ;;  %733 = vmatpush.msrb.mxu0 %v2830_v49  ;;  %v2420_v11 = vsub.f32 %v1397_v14, %v1397_v14  ;;  %v2832_v15 = vand.u32 4294901760, %v1932_v39  ;;  %vm2833_vm6 = vcmp.eq.s32.totalorder %v1752_v29, %v1644_v3  ;;  %v967_v8 = vand.u32 4294901760, %v2403_v19 }
  0x57   : > { %1452 = vmatpush.msk.msrb.mxu1 %vm294_vm8, %v2811_v41  ;;  %1470 = vmatpush.msk.msrb.mxu2 %vm308_vm12, %v2811_v41  ;;  %v950_v21 = vsub.f32 %v2318_v47, %v2831_v6  ;;  %v945_v54 = vand.u32 4294901760, %v944_v10  ;;  %v2834_v39 = vand.u32 4294901760, %v1957_v50  ;;  %v850_v29 = vand.u32 4294901760, %v2417_v4 }
  0x58   : > { %934 = vmatpush.msrb.mxu3 %v933_v7  ;;  %443 = vmatmul.f32.gmra.mxu0 %v442_v42  ;;  %v956_v42 = vsub.f32 %v2362_v61, %v955_v5  ;;  %vm2835_vm7 = vcmp.eq.s32.totalorder %v1803_v43, %v1644_v3  ;;  %v962_v7 = vsub.f32 %v2385_v17, %v961_v13  ;;  %v973_v50 = vand.u32 4294901760, %v2420_v11 }
  0x59   : > { %552 = vmatmul.f32.gmra.mxu1 %v2131_v22  ;;  %737 = vmatpush.msrb.mxu0 %v2832_v15  ;;  %v951_v14 = vand.u32 4294901760, %v950_v21  ;;  %v2454_v10 = vand.u32 4294901760, %v241_v9  ;;  %v2836_v49 = vand.u32 4294901760, %v1969_v58  ;;  %vm2837_vm8 = vcmp.eq.s32.totalorder %v1814_v48, %v1644_v3 }
  0x5a   : > { %1453 = vmatpush.msk.msrb.mxu1 %vm2833_vm6, %v2811_v41  ;;  %1471 = vmatpush.msk.msrb.mxu2 %vm307_vm1, %v2811_v41  ;;  %v957_v43 = vand.u32 4294901760, %v956_v42  ;;  %v851_v58 = vsub.f32 %v2417_v4, %v850_v29  ;;  %v2838_v6 = vand.u32 4294901760, %v2246_v32  ;;  %v2839_v48 = vand.u32 4294901760, %v1990_v30  ;;  %v243_v42 = vld [vmem:[%s1629_s24 + $0x28] sm:$0xff] }
  0x5b   : > { %940 = vmatpush.msrb.mxu3 %v939_v18  ;;  %741 = vmatpush.msrb.mxu0 %v2834_v39  ;;  %v968_v18 = vsub.f32 %v2403_v19, %v967_v8  ;;  %v963_v21 = vand.u32 4294901760, %v962_v7  ;;  %v974_v15 = vsub.f32 %v2420_v11, %v973_v50  ;;  %vm2840_vm6 = vcmp.eq.s32.totalorder %v1840_v55, %v1644_v3  ;;  %v2850_v7 = vld [vmem:[#allocation6_spill] sm:$0xff] }
  0x5c   : > { %1454 = vmatpush.msk.msrb.mxu1 %vm2835_vm7, %v2811_v41  ;;  %1472 = vmatpush.msk.msrb.mxu2 %vm306_vm2, %v2811_v41  ;;  %v852_v55 = vand.u32 4294901760, %v851_v58  ;;  %vm2841_vm7 = vcmp.eq.s32.totalorder %v1859_v59, %v1644_v3  ;;  %v2512_v59 = vand.u32 4294901760, %v243_v42  ;;  %v2844_v39 = vand.u32 4294901760, %v2047_v16 }
  0x5d   : > { %946 = vmatpush.msrb.mxu3 %v945_v54  ;;  %625 = vmatmul.f32.gmra.mxu2 %v2246_v32  ;;  %v2488_v32 = vsub.f32 %v241_v9, %v2454_v10  ;;  %v969_v30 = vand.u32 4294901760, %v968_v18  ;;  %v975_v54 = vand.u32 4294901760, %v974_v15  ;;  %v2855_v62 = vand.u32 4294901760, %v2168_v31 }
  0x5e   : > { %745 = vmatpush.msrb.mxu0 %v2836_v49  ;;  %1455 = vmatpush.msk.msrb.mxu1 %vm2837_vm8, %v2811_v41  ;;  %vm2842_vm8 = vcmp.eq.s32.totalorder %v1885_v1, %v1644_v3  ;;  %v2854_v49 = vand.u32 4294901760, %v2140_v53  ;;  %v2857_v56 = vand.u32 4294901760, %v2187_v25  ;;  %v2862_v58 = vand.u32 4294901760, %v2243_v35 }
  0x5f   : > { %1473 = vmatpush.msk.msrb.mxu2 %vm305_vm3, %v2811_v41  ;;  %952 = vmatpush.msrb.mxu3 %v951_v14  ;;  %v858_v9 = vand.u32 4294901760, %v2488_v32  ;;  %v2533_v14 = vsub.f32 %v243_v42, %v2512_v59  ;;  %v2864_v0 = vand.u32 4294901760, %v2307_v63 }
  0x60   : > { %682 = vmatmul.f32.gmra.mxu3 %v2838_v6  ;;  %749 = vmatpush.msrb.mxu0 %v2839_v48 }
  0x61   : > { %1456 = vmatpush.msk.msrb.mxu1 %vm2840_vm6, %v2811_v41  ;;  %1474 = vmatpush.msk.msrb.mxu2 %vm304_vm4, %v2811_v41  ;;  %vm2843_vm6 = vcmp.eq.s32.totalorder %v1911_v28, %v1644_v3  ;;  %v859_v1 = vsub.f32 %v2488_v32, %v858_v9  ;;  %v2846_v28 = vand.u32 4294901760, %v2070_v60 }
  0x62   : > { %958 = vmatpush.msrb.mxu3 %v957_v43  ;;  %751 = vmatmul.f32.vlgmr.msrb.gmra.mxu0 %v1783_v38 }
  0x63   : > { %556 = vmatmul.f32.gmra.mxu1 %v2224_v34  ;;  %1475 = vmatpush.msk.msrb.mxu2 %vm303_vm5, %v2811_v41 }
  0x64   : > { %1457 = vmatpush.msk.msrb.mxu1 %vm2841_vm7, %v2811_v41  ;;  %964 = vmatpush.msrb.mxu3 %v963_v21  ;;  %vm2845_vm7 = vcmp.eq.s32.totalorder %v1642_v2, %v1644_v3  ;;  %v860_v2 = vand.u32 4294901760, %v859_v1 }
  0x65   : > { %996 = vmatpush.msra.mxu0 %v2047_v16  ;;  %1476 = vmatpush.msk.msrb.mxu2 %vm302_vm10, %v2811_v41  ;;  %v2849_v16 = vand.u32 4294901760, %v2107_v12 }
  0x66   : > { %1458 = vmatpush.msk.msrb.mxu1 %vm2842_vm8, %v2811_v41  ;;  %970 = vmatpush.msrb.mxu3 %v969_v30  ;;  %vm2847_vm8 = vcmp.eq.s32.totalorder %v1997_v33, %v1644_v3  ;;  %v2853_v33 = vand.u32 4294901760, %v2120_v57 }
  0x67   : > { %999 = vmatpush.msra.mxu0 %v2070_v60  ;;  %853 = vmatmul.f32.vlgmr.msrb.gmra.mxu2 %v852_v55  ;;  %v245_v60 = vld [vmem:[%s1629_s24 + $0x38] sm:$0xff] }
  0x68   : > { %1459 = vmatpush.msk.msrb.mxu1 %vm2843_vm6, %v2811_v41  ;;  %976 = vmatpush.msrb.mxu3 %v975_v54  ;;  %vm2848_vm6 = vmmov %vm2847_vm8 }
  0x69   : > { %1002 = vmatpush.msra.mxu0 %v2107_v12  ;;  %1123 = vmatpush.msra.mxu2 %v2844_v39  ;;  %v2565_v12 = vand.u32 4294901760, %v245_v60 }
  0x6a   : > { %1460 = vmatpush.msk.msrb.mxu1 %vm2845_vm7, %v2811_v41  ;;  %978 = vmatmul.f32.vlgmr.msrb.gmra.mxu3 %v2377_v27  ;;  %vm2851_vm7 = vcmp.eq.s32.totalorder %v2850_v7, %v1644_v3 }
  0x6b   : > { %1005 = vmatpush.msra.mxu0 %v2120_v57  ;;  %1127 = vmatpush.msra.mxu2 %v2846_v28 }
  0x6c   : > { %1493 = vmatpush.msk.msra.mxu3 %vm2847_vm8, %v2811_v41  ;;  %755 = vmatmul.f32.gmra.mxu0 %v2016_v51  ;;  %vm2852_vm8 = vmmov %vm2851_vm7 }
  0x6d   : > { %800 = vmatmul.f32.vlgmr.msrb.gmra.mxu1 %v1783_v38  ;;  %1008 = vmatpush.msra.mxu0 %v2140_v53  ;;  %v866_v38 = vand.u32 4294901760, %v2533_v14  ;;  %v2590_v53 = vsub.f32 %v245_v60, %v2565_v12 }
  0x6e   : > { %1477 = vmatpush.msk.msra.mxu1 %vm2848_vm6, %v2811_v41  ;;  %1131 = vmatpush.msra.mxu2 %v2849_v16 }
  0x6f   : > { %1494 = vmatpush.msk.msra.mxu3 %vm2851_vm7, %v2811_v41  ;;  %1011 = vmatpush.msra.mxu0 %v2168_v31  ;;  %v867_v57 = vsub.f32 %v2533_v14, %v866_v38  ;;  %v2858_v31 = vand.u32 4294901760, %v2209_v52 }
  0x70   : > { %1478 = vmatpush.msk.msra.mxu1 %vm2852_vm8, %v2811_v41  ;;  %1135 = vmatpush.msra.mxu2 %v2853_v33 }
  0x71   : > { %1495 = vmatpush.msk.msra.mxu3 %vm315_vm15, %v2811_v41  ;;  %861 = vmatmul.f32.gmra.mxu2 %v860_v2  ;;  %v868_v18 = vand.u32 4294901760, %v867_v57 }
  0x72   : > { %1014 = vmatpush.msra.mxu0 %v2187_v25  ;;  %1479 = vmatpush.msk.msra.mxu1 %vm315_vm15, %v2811_v41  ;;  %v2859_v25 = vld [vmem:[#allocation8_spill] sm:$0xff] }
  0x73   : > { %1139 = vmatpush.msra.mxu2 %v2854_v49  ;;  %1496 = vmatpush.msk.msra.mxu3 %vm314_vm14, %v2811_v41 }
  0x74   : > { %982 = vmatmul.f32.gmra.mxu3 %v2454_v10  ;;  %1017 = vmatpush.msra.mxu0 %v2209_v52  ;;  %v2863_v52 = vand.u32 4294901760, %v2278_v37 }
  0x75   : > { %1480 = vmatpush.msk.msra.mxu1 %vm314_vm14, %v2811_v41  ;;  %1143 = vmatpush.msra.mxu2 %v2855_v62  ;;  %vm2860_vm14 = vcmp.eq.s32.totalorder %v2859_v25, %v1644_v3 }
  0x76   : > { %1497 = vmatpush.msk.msra.mxu3 %vm313_vm0, %v2811_v41  ;;  %759 = vmatmul.f32.gmra.mxu0 %v2131_v22  ;;  %vm2861_vm15 = vmmov %vm2860_vm14 }
  0x77   : > { %804 = vmatmul.f32.gmra.mxu1 %v2016_v51  ;;  %1020 = vmatpush.msra.mxu0 %v2243_v35  ;;  %v874_v51 = vand.u32 4294901760, %v2590_v53 }
  0x78   : > { %1481 = vmatpush.msk.msra.mxu1 %vm313_vm0, %v2811_v41  ;;  %1147 = vmatpush.msra.mxu2 %v2857_v56 }
  0x79   : > { %1498 = vmatpush.msk.msra.mxu3 %vm312_vm11, %v2811_v41  ;;  %1023 = vmatpush.msra.mxu0 %v2278_v37  ;;  %v875_v44 = vsub.f32 %v2590_v53, %v874_v51 }
  0x7a   : > { %1482 = vmatpush.msk.msra.mxu1 %vm312_vm11, %v2811_v41  ;;  %1151 = vmatpush.msra.mxu2 %v2858_v31 }
  0x7b   : > { %1499 = vmatpush.msk.msra.mxu3 %vm2860_vm14, %v2811_v41  ;;  %869 = vmatmul.f32.gmra.mxu2 %v868_v18  ;;  %v876_v35 = vand.u32 4294901760, %v875_v44 }
  0x7c   : > { %1026 = vmatpush.msra.mxu0 %v2307_v63  ;;  %1483 = vmatpush.msk.msra.mxu1 %vm2861_vm15, %v2811_v41 }
  0x7d   : > { %1155 = vmatpush.msra.mxu2 %v2862_v58  ;;  %1500 = vmatpush.msk.msra.mxu3 %vm310_vm9, %v2811_v41 }
  0x7e   : > { %986 = vmatmul.f32.gmra.mxu3 %v2512_v59  ;;  %1029 = vmatpush.msra.mxu0 %v2318_v47 }
  0x7f   : > { %1484 = vmatpush.msk.msra.mxu1 %vm310_vm9, %v2811_v41  ;;  %1159 = vmatpush.msra.mxu2 %v2863_v52  ;;  %vm1266_vm9 = vcmask 64512  }
  0x80   : > { %1501 = vmatpush.msk.msra.mxu3 %vm309_vm13, %v2811_v41  ;;  %763 = vmatmul.f32.gmra.mxu0 %v2224_v34 }
  0x81   : > { %808 = vmatmul.f32.gmra.mxu1 %v2131_v22  ;;  %1032 = vmatpush.msra.mxu0 %v2362_v61  ;;  %v2865_v22 = vand.u32 4294901760, %v2318_v47 }
  0x82   : > { %1485 = vmatpush.msk.msra.mxu1 %vm309_vm13, %v2811_v41  ;;  %1163 = vmatpush.msra.mxu2 %v2864_v0 }
  0x83   : > { %1502 = vmatpush.msk.msra.mxu3 %vm308_vm12, %v2811_v41  ;;  %1035 = vmatpush.msra.mxu0 %v2385_v17 }
  0x84   : > { %1486 = vmatpush.msk.msra.mxu1 %vm308_vm12, %v2811_v41  ;;  %1167 = vmatpush.msra.mxu2 %v2865_v22 }
  0x85   : > { %1503 = vmatpush.msk.msra.mxu3 %vm307_vm1, %v2811_v41  ;;  %877 = vmatmul.f32.gmra.mxu2 %v876_v35 }
  0x86   : > { %1038 = vmatpush.msra.mxu0 %v2403_v19  ;;  %1487 = vmatpush.msk.msra.mxu1 %vm307_vm1, %v2811_v41 }
  0x87   : > { %1171 = vmatpush.msra.mxu2 %v955_v5  ;;  %1504 = vmatpush.msk.msra.mxu3 %vm306_vm2, %v2811_v41 }
  0x88   : > { %990 = vmatmul.f32.gmra.mxu3 %v2565_v12  ;;  %1041 = vmatpush.msra.mxu0 %v2420_v11 }
  0x89   : > { %1488 = vmatpush.msk.msra.mxu1 %vm306_vm2, %v2811_v41  ;;  %1175 = vmatpush.msra.mxu2 %v961_v13 }
  0x8a   : > { %1505 = vmatpush.msk.msra.mxu3 %vm305_vm3, %v2811_v41  ;;  %1044 = vmatmul.f32.vlgmr.msra.gmra.mxu0 %v2417_v4 }
  0x8b   : > { %812 = vmatmul.f32.gmra.mxu1 %v2224_v34  ;;  %1179 = vmatpush.msra.mxu2 %v967_v8 }
  0x8c   : > { %1489 = vmatpush.msk.msra.mxu1 %vm305_vm3, %v2811_v41  ;;  %1506 = vmatpush.msk.msra.mxu3 %vm304_vm4, %v2811_v41 }
  0x8d   : > { %1183 = vmatpush.msra.mxu2 %v973_v50 }
  0x8e   : > { %1490 = vmatpush.msk.msra.mxu1 %vm304_vm4, %v2811_v41  ;;  %1507 = vmatpush.msk.msra.mxu3 %vm303_vm5, %v2811_v41 }
  0x8f   : > { %1185 = vmatmul.f32.vlgmr.msra.gmra.mxu2 %v2377_v27 }
  0x90   : > { %1491 = vmatpush.msk.msra.mxu1 %vm303_vm5, %v2811_v41  ;;  %1508 = vmatpush.msk.msra.mxu3 %vm302_vm10, %v2811_v41 }
  0x91   : > { %1234 = vmatmul.f32.vlgmr.msra.gmra.mxu3 %v2377_v27 }
  0x92   : > { %1492 = vmatpush.msk.msra.mxu1 %vm302_vm10, %v2811_v41  ;;  %1049 = vmatmul.f32.gmra.mxu0 %v2488_v32  ;;  %vm1285_vm10 = vcmask 0  }
  0x93   : > { %1098 = vmatmul.f32.vlgmr.msra.gmra.mxu1 %v850_v29 }
  0x97   : > { %1189 = vmatmul.f32.gmra.mxu2 %v2454_v10 }
  0x99   : > { %1238 = vmatmul.f32.gmra.mxu3 %v2454_v10 }
  0x9a   : > { %1054 = vmatmul.f32.gmra.mxu0 %v2533_v14 }
  0x9b   : > { %1104 = vmatmul.f32.gmra.mxu1 %v858_v9 }
  0x9f   : > { %1193 = vmatmul.f32.gmra.mxu2 %v2512_v59 }
  0xa1   : > { %1242 = vmatmul.f32.gmra.mxu3 %v2512_v59 }
  0xa2   : > { %1059 = vmatmul.f32.gmra.mxu0 %v2590_v53 }
  0xa3   : > { %1110 = vmatmul.f32.gmra.mxu1 %v866_v38 }
  0xa7   : > { %1197 = vmatmul.f32.gmra.mxu2 %v2565_v12 }
  0xa9   : > { %1246 = vmatmul.f32.gmra.mxu3 %v2565_v12 }
  0xab   : > { %1116 = vmatmul.f32.gmra.mxu1 %v874_v51 }
  0xb8   : > { %v420_v3 = vpop.f32.mrf.mxu0 }
  0xc0   : > { %v665_v40 = vpop.f32.mrf.mxu3 }
  0xc1   : > { %v428_v41 = vpop.f32.mrf.mxu0  ;;  %v545_v24 = vpop.f32.mrf.mxu1 }
  0xc2   : > { %v546_v26 = vadd.f32 %v545_v24, %v420_v3  ;;  %v611_v34 = vpop.f32.mrf.mxu2 }
  0xc4   : > { %v612_v45 = vadd.f32 %v611_v34, %v546_v26 }
  0xc6   : > { %v666_v20 = vadd.f32 %v665_v40, %v612_v45 }
  0xcb   : > { %v436_v37 = vpop.f32.mrf.mxu0  ;;  %v549_v63 = vpop.f32.mrf.mxu1 }
  0xcc   : > { %v616_v23 = vpop.f32.mrf.mxu2  ;;  %v550_v30 = vadd.f32 %v549_v63, %v428_v41 }
  0xce   : > { %v617_v54 = vadd.f32 %v616_v23, %v550_v30  ;;  %v1537_v30 = vld [vmem:[%s226_s27] ss:$0 sm:$0xff] }
  0xcf   : > { %v671_v47 = vpop.f32.mrf.mxu3 }
  0xd0   : > { %v672_v39 = vadd.f32 %v671_v47, %v617_v54  ;;  %v249_v47 = vld [vmem:[%s1639_s5 + $0x8] sm:$0xff] }
  0xd5   : > { %v444_v46 = vpop.f32.mrf.mxu0 }
  0xd6   : > { %v553_v36 = vpop.f32.mrf.mxu1  ;;  %v621_v61 = vpop.f32.mrf.mxu2 }
  0xd7   : > { %v554_v1 = vadd.f32 %v553_v36, %v436_v37 }
  0xd9   : > { %v677_v27 = vpop.f32.mrf.mxu3  ;;  %v622_v16 = vadd.f32 %v621_v61, %v554_v1 }
  0xdb   : > { %v678_v12 = vadd.f32 %v677_v27, %v622_v16 }
  0xdf   : > { %v752_v17 = vpop.f32.mrf.mxu0 }
  0xe0   : > { %v557_v5 = vpop.f32.mrf.mxu1  ;;  %v626_v19 = vpop.f32.mrf.mxu2  ;;  %v753_v28 = vadd.f32 %v752_v17, %v666_v20  ;;  %v248_v17 = vld [vmem:[%s1639_s5] sm:$0xff] }
  0xe1   : > { %v558_v49 = vadd.f32 %v557_v5, %v444_v46 }
  0xe3   : > { %v683_v4 = vpop.f32.mrf.mxu3  ;;  %v627_v56 = vadd.f32 %v626_v19, %v558_v49 }
  0xe5   : > { %v684_v35 = vadd.f32 %v683_v4, %v627_v56 }
  0xe9   : > { %v756_v13 = vpop.f32.mrf.mxu0 }
  0xea   : > { %v801_v11 = vpop.f32.mrf.mxu1  ;;  %v854_v8 = vpop.f32.mrf.mxu2  ;;  %v757_v14 = vadd.f32 %v756_v13, %v672_v39  ;;  %v251_v39 = vld [vmem:[%s1639_s5 + $0x18] sm:$0xff] }
  0xeb   : > { %v802_v60 = vadd.f32 %v801_v11, %v753_v28  ;;  %v250_v11 = vld [vmem:[%s1639_s5 + $0x10] sm:$0xff] }
  0xed   : > { %v979_v29 = vpop.f32.mrf.mxu3  ;;  %v855_v57 = vadd.f32 %v854_v8, %v802_v60 }
  0xef   : > { %v980_v51 = vadd.f32 %v979_v29, %v855_v57 }
  0xf3   : > { %v760_v50 = vpop.f32.mrf.mxu0 }
  0xf4   : > { %v805_v10 = vpop.f32.mrf.mxu1  ;;  %v862_v6 = vpop.f32.mrf.mxu2  ;;  %v761_v43 = vadd.f32 %v760_v50, %v678_v12 }
  0xf5   : > { %v806_v7 = vadd.f32 %v805_v10, %v757_v14 }
  0xf7   : > { %v983_v48 = vpop.f32.mrf.mxu3  ;;  %v863_v62 = vadd.f32 %v862_v6, %v806_v7 }
  0xf9   : > { %v984_v31 = vadd.f32 %v983_v48, %v863_v62 }
  0xfd   : > { %v764_v21 = vpop.f32.mrf.mxu0 }
  0xfe   : > { %v809_v15 = vpop.f32.mrf.mxu1  ;;  %v870_v32 = vpop.f32.mrf.mxu2  ;;  %v765_v26 = vadd.f32 %v764_v21, %v684_v35 }
  0xff   : > { %v810_v25 = vadd.f32 %v809_v15, %v761_v43 }
 0x101   : > { %v987_v55 = vpop.f32.mrf.mxu3  ;;  %v871_v0 = vadd.f32 %v870_v32, %v810_v25 }
 0x103   : > { %v988_v45 = vadd.f32 %v987_v55, %v871_v0 }
 0x107   : > { %v1045_v42 = vpop.f32.mrf.mxu0 }
 0x108   : > { %v813_v9 = vpop.f32.mrf.mxu1  ;;  %v878_v59 = vpop.f32.mrf.mxu2  ;;  %v1046_v58 = vadd.f32 %v1045_v42, %v980_v51 }
 0x109   : > { %v814_v20 = vadd.f32 %v813_v9, %v765_v26 }
 0x10b   : > { %v991_v2 = vpop.f32.mrf.mxu3  ;;  %v879_v36 = vadd.f32 %v878_v59, %v814_v20 }
 0x10d   : > { %v992_v29 = vadd.f32 %v991_v2, %v879_v36 }
 0x10f   : > { %v1050_v38 = vpop.f32.mrf.mxu0 }
 0x110   : > { %v1099_v33 = vpop.f32.mrf.mxu1  ;;  %v1051_v44 = vadd.f32 %v1050_v38, %v984_v31 }
 0x111   : > { %v1100_v22 = vadd.f32 %v1099_v33, %v1046_v58 }
 0x112   : > { %v1186_v53 = vpop.f32.mrf.mxu2 }
 0x113   : > { %v1187_v37 = vadd.f32 %v1186_v53, %v1100_v22 }
 0x114   : > { %v1235_v18 = vpop.f32.mrf.mxu3 }
 0x115   : > { %v1236_v61 = vadd.f32 %v1235_v18, %v1187_v37 }
 0x117   : > { %v1055_v41 = vpop.f32.mrf.mxu0  ;;  %v1251_v50 = vsub.f32 %v1236_v61, %v248_v17 }
 0x118   : > { %v1105_v52 = vpop.f32.mrf.mxu1  ;;  %v1056_v63 = vadd.f32 %v1055_v41, %v988_v45 }
 0x119   : > { %v1106_v3 = vadd.f32 %v1105_v52, %v1051_v44  ;;  %v1255_v32 = vand.u32 2147483647, %v1251_v50  ;;  %v1250_v44 = vld [vmem:[#allocation2] sm:$0x1] }
 0x11a   : > { %v1190_v24 = vpop.f32.mrf.mxu2 }
 0x11b   : > { %v1191_v34 = vadd.f32 %v1190_v24, %v1106_v3  ;;  %v1262_v28 = vmul.f32 %v1537_v30, %v1255_v32 }
 0x11c   : > { %v1239_v40 = vpop.f32.mrf.mxu3 }
 0x11d   : > { %v1240_v23 = vadd.f32 %v1239_v40, %v1191_v34  ;;  %v1267_v38 = vsel %vm1266_vm9, %v1262_v28, 0.0 }
 0x11f   : > { %v1252_v19 = vsub.f32 %v1240_v23, %v249_v47  ;;  %v1060_v13 = vpop.f32.mrf.mxu0 }
 0x120   : > { %v1111_v46 = vpop.f32.mrf.mxu1  ;;  %v1061_v48 = vadd.f32 %v1060_v13, %v992_v29 }
 0x121   : > { %v1112_v27 = vadd.f32 %v1111_v46, %v1056_v63  ;;  %v1256_v6 = vand.u32 2147483647, %v1252_v19 }
 0x122   : > { %v1194_v5 = vpop.f32.mrf.mxu2 }
 0x123   : > { %v1195_v4 = vadd.f32 %v1194_v5, %v1112_v27  ;;  %v1263_v9 = vmul.f32 %v1537_v30, %v1256_v6 }
 0x124   : > { %v1243_v8 = vpop.f32.mrf.mxu3 }
 0x125   : > { %v1244_v10 = vadd.f32 %v1243_v8, %v1195_v4  ;;  %v1268_v60 = vsel %vm1266_vm9, %v1263_v9, 0.0 }
 0x126   : > { %v1269_v12 = vadd.f32 %v1268_v60, %v1267_v38 }
 0x127   : > { %v1253_v21 = vsub.f32 %v1244_v10, %v250_v11 }
 0x128   : > { %v1117_v15 = vpop.f32.mrf.mxu1 }
 0x129   : > { %v1257_v55 = vand.u32 2147483647, %v1253_v21  ;;  %v1118_v54 = vadd.f32 %v1117_v15, %v1061_v48 }
 0x12a   : > { %v1198_v42 = vpop.f32.mrf.mxu2 }
 0x12b   : > { %v1199_v59 = vadd.f32 %v1198_v42, %v1118_v54  ;;  %v1264_v2 = vmul.f32 %v1537_v30, %v1257_v55 }
 0x12c   : > { %v1247_v1 = vpop.f32.mrf.mxu3 }
 0x12d   : > { %v1248_v14 = vadd.f32 %v1247_v1, %v1199_v59  ;;  %v1270_v33 = vsel %vm1266_vm9, %v1264_v2, 0.0 }
 0x12e   : > { %v1271_v57 = vadd.f32 %v1270_v33, %v1269_v12 }
 0x12f   : > { %v1254_v16 = vsub.f32 %v1248_v14, %v251_v39 }
 0x131   : > { %v1258_v7 = vand.u32 2147483647, %v1254_v16 }
 0x133   : > { %v1265_v49 = vmul.f32 %v1537_v30, %v1258_v7 }
 0x135   : > { %v1272_v62 = vsel %vm1266_vm9, %v1265_v49, 0.0 }
 0x136   : > { %v1273_v53 = vadd.f32 %v1272_v62, %v1271_v57 }
 0x138   : > { %1274 = vadd.xlane.f32.xlu0 %v1273_v53 }
 0x1ab   : > { %v1275_v43 = vpop.xlane.xlu0 %1274 }
 0x1ac   : > { %v1276_v18 = vrot.slane %v1275_v43, 4 }
 0x1ae   : > { %v1277_v56 = vadd.f32 %v1276_v18, %v1275_v43 }
 0x1b0   : > { %v1278_v51 = vrot.slane %v1277_v56, 2 }
 0x1b2   : > { %v1279_v31 = vadd.f32 %v1278_v51, %v1277_v56 }
 0x1b4   : > { %v1280_v25 = vrot.slane %v1279_v31, 1 }
 0x1b6   : > { %v1281_v58 = vadd.f32 %v1280_v25, %v1279_v31 }
 0x1b8   : > { %1516 = vpush %v1281_v58 }
 0x1e9   : > { %s1517_s8 = spop %1516  ;;  %1290 = sbr.rel (%p1509_p5) target bundleno = 504 (0x1f8), region = 44 }
 0x1ea   : > { %v1283_v52 = vstv %s1517_s8 }
 0x1eb   : > { %v1284_v35 = vadd.f32 %v1283_v52, %v1250_v44 }
 0x1ed   : > { %1286 = vst.msk [vmem:[#allocation2] sm:$0x1] %vm1285_vm10, %v1284_v35 }
 0x1f4   : > { %v1291_v0 = vld [vmem:[#allocation2] sm:$0x1] }
 0x1f5   : > { %v1292_v22 = vmul.f32 0.001953125, %v1291_v0 }
 0x1f7   : > { %1293 = vst.msk [vmem:[#allocation3] sm:$0x1] %vm1285_vm10, %v1292_v22 }
 0x1f8 PF: > { %p1522_p6 = scmp.eq.s32.totalorder %s1613_s16, 1  ;;  %s1581_s9 = smov [#allocation3]  }
 0x1f9   : > { %s1300_s10 = sshll.u32 %s1581_s9, 4  ;;  %s1302_s13 = sshll.u32 %s2764_s4, 4  ;;  %s1301_s10 = int_to_ptr.vmem [resolvable:$true] %s1300_s10  ;;  %s1303_s13 = int_to_ptr.hbm [resolvable:$true] %s1302_s13 }
 0x1fa   : > { %1519 = dma.vmem_to_hbm [thread:$0]  (%p1522_p6), %s1301_s10, 16, %s1303_s13, [#allocation4]  }
 0x1fb   : > { %1571 = dma.done.wait (%p1522_p6), [#allocation4], 16  }
 0x1fc   : > { %1573 = vsyncadd (%p1522_p6), [#allocation4], 4294967280 }
 0x1fd PF: > { %s15_s15 = sadd.s32 1, %s1576_s15  }
 0x1fe   : > { %p12_p7 = scmp.ge.s32.totalorder %s15_s15, 4  }
 0x200   :  { %14 = sbr.rel (!%p12_p7) target bundleno = 1 (0x1), region = 80 }
 0x205   :  { %1316 = vsyncpa [#allocation4], 1 }
 0x206   :  { %1318 = vsyncpa [#allocation4 + $0x1], 1 }

</bundles_post_ra>
